<compile_context>
chip_gen: v6e
topology: v6e:2x2x1
jax: 0.10.0
libtpu: 0.0.40
codegen_flags: <defaults>
</compile_context>

<pallas_src>
import functools
import math

import jax
import jax.numpy as jnp
from jax.experimental import pallas as pl
from jax.experimental.pallas import tpu as pltpu


_LANE = 128       # vreg lane width
_ROW_TILE = 2048  # 2048 x 128 f32 = 1 MiB per stream per step


def _vdp_kernel(hid_ref, htmp_ref, out_ref, *, alpha1, alpha2, W, alpha3):
    """hid_ref/out_ref: (2, rows_tile, 128); htmp_ref: (rows_tile, 128)."""
    h1 = hid_ref[0]
    h2 = hid_ref[1]
    a1_plus_w = alpha1 + W  # Python floats -> folded at trace time
    out_ref[0] = (h1 * (a1_plus_w - alpha1 * (h2 * h2))
                  + alpha2 * h2 + alpha3 * htmp_ref[...])
    out_ref[1] = -h1


def _vdp_kernel_no_htmp(hid_ref, out_ref, *, alpha1, alpha2, W):
    """Specialization for h_tmp == 0 (lazy init in the module) or alpha3 == 0."""
    h1 = hid_ref[0]
    h2 = hid_ref[1]
    a1_plus_w = alpha1 + W
    out_ref[0] = h1 * (a1_plus_w - alpha1 * (h2 * h2)) + alpha2 * h2
    out_ref[1] = -h1


def van_der_pol_forward(t, hidden, h_tmp=None, *, alpha1, alpha2, W, alpha3):
    """hidden: (2, B, C, L); h_tmp: (B, C, L) or None (-> zeros). Returns (2, B, C, L)."""
    del t  # unused in the original forward
    assert hidden.shape[0] == 2
    state_shape = hidden.shape[1:]
    dtype = hidden.dtype
    n = math.prod(state_shape)

    # Module initializes h_tmp to zeros lazily; alpha3 * 0 contributes nothing,
    # so skip the h_tmp stream entirely in that case (and when alpha3 == 0).
    use_htmp = (h_tmp is not None) and (alpha3 != 0.0)

    # Lane-dense layout: flatten to (rows, 128). Pad only to lane alignment
    # (often a no-op); the ragged last row-block is masked by Pallas.
    n_pad = pl.cdiv(n, _LANE) * _LANE
    rows = n_pad // _LANE
    row_tile = min(rows, _ROW_TILE)   # full-dim block when small, else 2048 (mult of 8)
    num_tiles = pl.cdiv(rows, row_tile)

    hid_flat = hidden.reshape(2, n)
    if n_pad != n:
        hid_flat = jnp.pad(hid_flat, ((0, 0), (0, n_pad - n)))
    hid2d = hid_flat.reshape(2, rows, _LANE)

    elt = jnp.dtype(dtype).itemsize
    if use_htmp:
        htmp_flat = h_tmp.astype(dtype).reshape(n)
        if n_pad != n:
            htmp_flat = jnp.pad(htmp_flat, ((0, n_pad - n),))
        htmp2d = htmp_flat.reshape(rows, _LANE)
        kernel = functools.partial(
            _vdp_kernel, alpha1=alpha1, alpha2=alpha2, W=W, alpha3=alpha3)
        in_specs = [
            pl.BlockSpec((2, row_tile, _LANE), lambda i: (0, i, 0)),
            pl.BlockSpec((row_tile, _LANE), lambda i: (i, 0)),
        ]
        operands = (hid2d, htmp2d)
        bytes_accessed = 5 * n_pad * elt   # read h1,h2,htmp; write dh1,dh2
        flops = 9 * n_pad
    else:
        kernel = functools.partial(
            _vdp_kernel_no_htmp, alpha1=alpha1, alpha2=alpha2, W=W)
        in_specs = [pl.BlockSpec((2, row_tile, _LANE), lambda i: (0, i, 0))]
        operands = (hid2d,)
        bytes_accessed = 4 * n_pad * elt   # read h1,h2; write dh1,dh2
        flops = 7 * n_pad

    out2d = pl.pallas_call(
        kernel,
        out_shape=jax.ShapeDtypeStruct((2, rows, _LANE), dtype),
        grid_spec=pltpu.PrefetchScalarGridSpec(
            num_scalar_prefetch=0,
            grid=(num_tiles,),
            in_specs=in_specs,
            out_specs=pl.BlockSpec((2, row_tile, _LANE), lambda i: (0, i, 0)),
        ),
        compiler_params=pltpu.CompilerParams(
            dimension_semantics=("parallel",),
            vmem_limit_bytes=32 * 1024 * 1024,
        ),
        cost_estimate=pl.CostEstimate(
            flops=flops, transcendentals=0, bytes_accessed=bytes_accessed),
    )(*operands)

    out_flat = out2d.reshape(2, n_pad)
    if n_pad != n:
        out_flat = out_flat[:, :n]
    return out_flat.reshape((2,) + state_shape)


def van_der_pol_reference(t, hidden, h_tmp, *, alpha1, alpha2, W, alpha3):
    h1, h2 = hidden[0], hidden[1]
    dh1dt = alpha1 * h1 * (1.0 - h2 ** 2) + alpha2 * h2 + W * h1 + alpha3 * h_tmp
    dh2dt = -h1
    return jnp.stack([dh1dt, dh2dt], axis=0)


if __name__ == "__main__":
    # Deterministic scalar "parameters" of the module (set in __init__).
    alpha1, alpha2, W, alpha3 = 0.5, -0.25, 0.1, 0.75

    # Small shapes: batch=2, channels=4, seq=16.
    B, C, L = 2, 4, 16
    key = jax.random.PRNGKey(0)
    k1, k2, k3 = jax.random.split(key, 3)
    h1 = jax.random.normal(k1, (B, C, L), dtype=jnp.float32)
    h2 = jax.random.normal(k2, (B, C, L), dtype=jnp.float32)
    hidden = jnp.stack([h1, h2], axis=0)
    t = jnp.float32(0.0)

    fwd = jax.jit(
        functools.partial(
            van_der_pol_forward, alpha1=alpha1, alpha2=alpha2, W=W, alpha3=alpha3
        )
    )

    # Path 1: h_tmp is None (module's lazy zero-init) -> specialized kernel.
    out_none = jax.block_until_ready(fwd(t, hidden, None))
    ref_none = van_der_pol_reference(
        t, hidden, jnp.zeros((B, C, L), jnp.float32),
        alpha1=alpha1, alpha2=alpha2, W=W, alpha3=alpha3)
    assert out_none.shape == (2, B, C, L)
    assert jnp.allclose(out_none, ref_none, atol=1e-6, rtol=1e-6)

    # Path 2: explicit h_tmp -> full kernel with the h_tmp stream.
    h_tmp = jax.random.normal(k3, (B, C, L), dtype=jnp.float32)
    out_full = jax.block_until_ready(fwd(t, hidden, h_tmp))
    ref_full = van_der_pol_reference(
        t, hidden, h_tmp, alpha1=alpha1, alpha2=alpha2, W=W, alpha3=alpha3)
    assert out_full.shape == (2, B, C, L)
    assert jnp.allclose(out_full, ref_full, atol=1e-6, rtol=1e-6)

    print("KERNEL_OK")
</pallas_src>

<mosaic_0001>
module attributes {stable_mosaic.version = 11 : i64} {
  func.func @_vdp_kernel_no_htmp(%arg0: i32, %arg1: memref<2x1x128xf32, #tpu.memory_space<vmem>>, %arg2: memref<2x1x128xf32, #tpu.memory_space<vmem>>) attributes {dimension_semantics = [#tpu.dimension_semantics<parallel>], iteration_bounds = array<i64: 1>, scalar_prefetch = 0 : i64, scratch_operands = 0 : i64, tpu.core_type = #tpu.core_type<tc>, window_params = [{transform_indices = @transform_0, window_bounds = array<i64: 2, 1, 128>}, {transform_indices = @transform_1, window_bounds = array<i64: 2, 1, 128>}]} {
    %c0 = arith.constant 0 : index
    %c0_0 = arith.constant 0 : index
    %c0_1 = arith.constant 0 : index
    %0 = vector.load %arg1[%c0, %c0_0, %c0_1] : memref<2x1x128xf32, #tpu.memory_space<vmem>>, vector<1x1x128xf32>
    %1 = vector.shape_cast %0 : vector<1x1x128xf32> to vector<1x128xf32>
    %c1 = arith.constant 1 : index
    %c0_2 = arith.constant 0 : index
    %c0_3 = arith.constant 0 : index
    %2 = vector.load %arg1[%c1, %c0_2, %c0_3] : memref<2x1x128xf32, #tpu.memory_space<vmem>>, vector<1x1x128xf32>
    %3 = vector.shape_cast %2 : vector<1x1x128xf32> to vector<1x128xf32>
    %4 = arith.mulf %3, %3 : vector<1x128xf32>
    %cst = arith.constant 5.000000e-01 : f32
    %5 = vector.broadcast %cst : f32 to vector<1x128xf32>
    %6 = arith.mulf %5, %4 : vector<1x128xf32>
    %cst_4 = arith.constant 6.000000e-01 : f32
    %7 = vector.broadcast %cst_4 : f32 to vector<1x128xf32>
    %8 = arith.subf %7, %6 : vector<1x128xf32>
    %9 = arith.mulf %1, %8 : vector<1x128xf32>
    %cst_5 = arith.constant -2.500000e-01 : f32
    %10 = vector.broadcast %cst_5 : f32 to vector<1x128xf32>
    %11 = arith.mulf %10, %3 : vector<1x128xf32>
    %12 = arith.addf %9, %11 : vector<1x128xf32>
    %c0_6 = arith.constant 0 : index
    %c0_7 = arith.constant 0 : index
    %c0_8 = arith.constant 0 : index
    %13 = vector.load %arg2[%c0_6, %c0_7, %c0_8] : memref<2x1x128xf32, #tpu.memory_space<vmem>>, vector<1x1x128xf32>
    %14 = vector.shape_cast %13 : vector<1x1x128xf32> to vector<1x128xf32>
    %15 = vector.shape_cast %12 : vector<1x128xf32> to vector<1x1x128xf32>
    tpu.vector_store %arg2[%c0_6, %c0_7, %c0_8], %15 {strides = array<i32>} : memref<2x1x128xf32, #tpu.memory_space<vmem>>, vector<1x1x128xf32>,
    %cst_9 = arith.constant 0.000000e+00 : f32
    %16 = vector.broadcast %cst_9 : f32 to vector<1x128xf32>
    %17 = arith.subf %16, %1 : vector<1x128xf32>
    %c1_10 = arith.constant 1 : index
    %c0_11 = arith.constant 0 : index
    %c0_12 = arith.constant 0 : index
    %18 = vector.load %arg2[%c1_10, %c0_11, %c0_12] : memref<2x1x128xf32, #tpu.memory_space<vmem>>, vector<1x1x128xf32>
    %19 = vector.shape_cast %18 : vector<1x1x128xf32> to vector<1x128xf32>
    %20 = vector.shape_cast %17 : vector<1x128xf32> to vector<1x1x128xf32>
    tpu.vector_store %arg2[%c1_10, %c0_11, %c0_12], %20 {strides = array<i32>} : memref<2x1x128xf32, #tpu.memory_space<vmem>>, vector<1x1x128xf32>,
    return
  }
  func.func @transform_0(%arg0: i32) -> (i32, i32, i32) {
    %c0_i32 = arith.constant 0 : i32
    %c0_i32_0 = arith.constant 0 : i32
    %c0_i32_1 = arith.constant 0 : i32
    return %c0_i32, %arg0, %c0_i32_0 : i32, i32, i32
  }
  func.func @transform_1(%arg0: i32) -> (i32, i32, i32) {
    %c0_i32 = arith.constant 0 : i32
    %c0_i32_0 = arith.constant 0 : i32
    %c0_i32_1 = arith.constant 0 : i32
    return %c0_i32, %arg0, %c0_i32_0 : i32, i32, i32
  }
}

</mosaic_0001>

<bundles_post_ra>
// kernel: van_der_pol_forward.1
= control target key start
LH: loop header
LB: loop body
LE: loop exit
PB: predicated region body
PF: predicated region fallthrough
CT: control target
= control target key end

     0   :  { %s49_s0 = inlined_call_operand.vmem [shape: f32[2,1,128], index: 0, kind: input, shape index: {}]   ;;  %s50_s1 = inlined_call_operand.vmem [shape: f32[2,1,128], index: 1, kind: output, shape index: {}]  }
   0x1   :  { %v8_v0 = vld [vmem:[%s49_s0] sm:$0x1]  ;;  %v25_v1 = vld [vmem:[%s49_s0 + $0x1] sm:$0x1] }
   0x2   :  { %v11_v2 = vmul.f32 %v25_v1, %v25_v1  ;;  %v18_v3 = vsub.f32 0.0, %v8_v0  ;;  %v15_v6 = vmul.f32 -0.25, %v25_v1 }
   0x4   :  { %v12_v4 = vmul.f32 0.5, %v11_v2  ;;  %26 = vst [vmem:[%s50_s1 + $0x1] sm:$0x1] %v18_v3 }
   0x6   :  { %v13_v5 = vsub.f32 0.6, %v12_v4 }
   0x8   :  { %v14_v7 = vmul.f32 %v13_v5, %v8_v0 }
   0xa   :  { %v16_v8 = vadd.f32 %v15_v6, %v14_v7 }
   0xc   :  { %17 = vst [vmem:[%s50_s1] sm:$0x1] %v16_v8 }

</bundles_post_ra>
